<compile_context>
chip_gen: v7x
topology: tpu7x:2x2x1
jax: 0.10.0
libtpu: 0.0.40
codegen_flags: <defaults>
</compile_context>

<pallas_src>
import functools

import jax
import jax.numpy as jnp
from jax.experimental import pallas as pl
from jax.experimental.pallas import tpu as pltpu

IN_FEATURES = 32
NUM_CLASSES = 8
NUM_DISEASE = NUM_CLASSES - 1          # 7
HALF = IN_FEATURES // 2                # 16
GROUPED = NUM_DISEASE * HALF           # 112
ZDIM = HALF + GROUPED                  # 128
LN_EPS = 1e-5

# Rows of the packed "vecs" [16, 128] slab.
_V_FE_B, _V_FE_G, _V_FE_BT = 0, 1, 2
_V_NB_B1, _V_NB_G, _V_NB_BT = 3, 4, 5
_V_DS_B, _V_DS_G, _V_DS_BT = 6, 7, 8
_V_DSP_B, _V_DSP_G, _V_DSP_BT = 9, 10, 11
_V_BFIN = 12
_NUM_VEC_ROWS = 16                      # padded to a sublane multiple

# Slabs of the packed "w32" [4, 32, 128] array.
_W_FE, _W_NB1, _W_DS, _W_DSP = range(4)


def _classifier_kernel(x_ref, w32_ref, wfin_ref, vec_ref, avg_ref, out_ref):
    x = x_ref[...]

    def vec(row, width):
        return vec_ref[row:row + 1, :width]                      # [1, width]

    def linear(inp, slab, width, bias_row):
        w = w32_ref[slab][:, :width]                             # [32, width]
        return (jnp.dot(inp, w, preferred_element_type=jnp.float32)
                + vec(bias_row, width))

    def ln_relu(h, width, g_row, b_row):
        mu = jnp.mean(h, axis=-1, keepdims=True)
        var = jnp.mean((h - mu) ** 2, axis=-1, keepdims=True)    # biased (PyTorch LN)
        hn = (h - mu) * jax.lax.rsqrt(var + LN_EPS)
        return jnp.maximum(hn * vec(g_row, width) + vec(b_row, width), 0.0)

    # feature_enhancement: Linear -> LayerNorm -> ReLU -> Dropout(0.2) (eval: id)
    h = ln_relu(linear(x, _W_FE, IN_FEATURES, _V_FE_B),
                IN_FEATURES, _V_FE_G, _V_FE_BT)

    # normal_branch first Linear + LN + ReLU; its final Linear(16,1) is folded
    # into the block-diagonal wfin matmul below.
    n = ln_relu(linear(h, _W_NB1, HALF, _V_NB_B1), HALF, _V_NB_G, _V_NB_BT)

    # disease_shared: Linear -> LayerNorm -> ReLU -> Dropout(0.2) (eval: id)
    d = ln_relu(linear(h, _W_DS, IN_FEATURES, _V_DS_B),
                IN_FEATURES, _V_DS_G, _V_DS_BT)

    # Attention (length-1 sequence => out_proj(v_proj(d)), exact) fused with
    # the 7 disease heads' first Linear into ONE lane-dense matmul (fold done
    # host-side in pack_params).
    t = linear(d, _W_DSP, GROUPED, _V_DSP_B)                     # [B, 112]

    # Grouped LayerNorm (7 independent groups of 16 lanes) via a precomputed
    # block-diagonal averaging matmul: keeps the [B,112] lane layout.
    avg = avg_ref[...]                                           # [112, 112]
    mu = jnp.dot(t, avg, preferred_element_type=jnp.float32)     # group means
    c = t - mu
    var = jnp.dot(c * c, avg, preferred_element_type=jnp.float32)
    t = jnp.maximum(c * jax.lax.rsqrt(var + LN_EPS) * vec(_V_DSP_G, GROUPED)
                    + vec(_V_DSP_BT, GROUPED), 0.0)              # [B, 112]

    # Final block-diagonal second-stage weights (class_weights pre-folded):
    # column 0 = normal branch, columns 1..7 = the 7 disease heads.
    wfin = wfin_ref[...]                                         # [128, 8]
    out_ref[...] = (jnp.dot(n, wfin[:HALF, :], preferred_element_type=jnp.float32)
                    + jnp.dot(t, wfin[HALF:, :], preferred_element_type=jnp.float32)
                    + vec(_V_BFIN, NUM_CLASSES))


def pack_params(params):
    """Pack the 25 natural (PyTorch-layout) parameters into 4 TPU-friendly arrays."""
    (fe_w, fe_b, fe_g, fe_bt,
     nb_w1, nb_b1, nb_g, nb_bt, nb_w2, nb_b2,
     ds_w, ds_b, ds_g, ds_bt,
     at_vw, at_vb, at_ow, at_ob,
     dsp_w1, dsp_b1, dsp_g, dsp_bt, dsp_w2, dsp_b2,
     cw) = params

    hp = functools.partial(jnp.dot, precision=jax.lax.Precision.HIGHEST)

    def pad_lanes(a, lanes=128):
        return jnp.pad(a, ((0, 0), (0, lanes - a.shape[1])))

    def cat_heads(a):  # [7, 1, 16] -> [1, 112]; head i occupies lanes 16i..16i+15
        return jnp.transpose(a, (1, 0, 2)).reshape(1, GROUPED)

    # [7, 32, 16] -> [32, 112]; columns 16i:16i+16 belong to head i.
    dsp_w1_cat = jnp.transpose(dsp_w1, (1, 0, 2)).reshape(IN_FEATURES, GROUPED)
    dsp_b1_cat = cat_heads(dsp_b1)

    # Fold: attention on length-1 sequence == out_proj(v_proj(.)), then the
    # disease heads' first Linear follows with no nonlinearity in between.
    w_at = hp(at_vw, at_ow)                                      # [32, 32]
    b_at = hp(at_vb, at_ow) + at_ob                              # [1, 32]
    w_dsp = hp(w_at, dsp_w1_cat)                                 # [32, 112]
    b_dsp = hp(b_at, dsp_w1_cat) + dsp_b1_cat                    # [1, 112]

    w32 = jnp.stack([
        pad_lanes(fe_w), pad_lanes(nb_w1), pad_lanes(ds_w), pad_lanes(w_dsp),
    ]).astype(jnp.float32)                                       # [4, 32, 128]

    # Block-diagonal final weights [128, 8] with class_weights folded in.
    wfin = jnp.zeros((ZDIM, NUM_CLASSES), jnp.float32)
    wfin = wfin.at[:HALF, 0:1].set(nb_w2)
    for i in range(NUM_DISEASE):
        r0 = HALF + i * HALF
        wfin = wfin.at[r0:r0 + HALF, i + 1:i + 2].set(dsp_w2[i])
    b_fin = jnp.concatenate([nb_b2] + [dsp_b2[i] for i in range(NUM_DISEASE)],
                            axis=1)                              # [1, 8]
    wfin = (wfin * cw).astype(jnp.float32)
    b_fin = b_fin * cw

    rows = [fe_b, fe_g, fe_bt, nb_b1, nb_g, nb_bt, ds_b, ds_g, ds_bt,
            b_dsp, cat_heads(dsp_g), cat_heads(dsp_bt), b_fin]
    vecs = jnp.concatenate([pad_lanes(r) for r in rows], axis=0)
    vecs = jnp.pad(vecs, ((0, _NUM_VEC_ROWS - vecs.shape[0]), (0, 0))
                   ).astype(jnp.float32)                         # [16, 128]

    # Grouped-LayerNorm block-diagonal averaging matrix (precomputed once).
    ri = jnp.arange(GROUPED)[:, None] // HALF
    ci = jnp.arange(GROUPED)[None, :] // HALF
    avg = jnp.where(ri == ci, 1.0 / HALF, 0.0).astype(jnp.float32)  # [112, 112]

    return w32, wfin, vecs, avg


def multi_head_disease_classifier(x, packed, *, block_b=1024):
    """Batch-tiled Pallas call; packed weights stay VMEM-resident across steps."""
    w32, wfin, vecs, avg = packed
    b = x.shape[0]
    bp = -(-b // 8) * 8                      # sublane-align the batch
    tb = min(block_b, bp)                    # batch tile (multiple of 8)
    bp = -(-bp // tb) * tb                   # make divisible by the tile
    if bp != b:
        x = jnp.pad(x, ((0, bp - b), (0, 0)))

    out = pl.pallas_call(
        _classifier_kernel,
        out_shape=jax.ShapeDtypeStruct((bp, NUM_CLASSES), jnp.float32),
        grid_spec=pltpu.PrefetchScalarGridSpec(
            num_scalar_prefetch=0,
            grid=(bp // tb,),
            in_specs=[
                pl.BlockSpec((tb, IN_FEATURES), lambda i: (i, 0)),
                pl.BlockSpec((4, IN_FEATURES, 128), lambda i: (0, 0, 0)),
                pl.BlockSpec((ZDIM, NUM_CLASSES), lambda i: (0, 0)),
                pl.BlockSpec((_NUM_VEC_ROWS, 128), lambda i: (0, 0)),
                pl.BlockSpec((GROUPED, GROUPED), lambda i: (0, 0)),
            ],
            out_specs=pl.BlockSpec((tb, NUM_CLASSES), lambda i: (i, 0)),
        ),
        compiler_params=pltpu.CompilerParams(
            dimension_semantics=("parallel",)),
    )(x, w32, wfin, vecs, avg)
    return out[:b]


def init_params(key):
    """Deterministic synthetic parameters (shapes from the module __init__)."""
    f, h = IN_FEATURES, HALF
    ks = jax.random.split(key, 20)

    def w(k, shape, scale=0.1):
        return (scale * jax.random.normal(k, shape)).astype(jnp.float32)

    params = (
        # feature_enhancement
        w(ks[0], (f, f)), w(ks[1], (1, f), 0.02),
        jnp.ones((1, f), jnp.float32), w(ks[2], (1, f), 0.02),
        # normal_branch
        w(ks[3], (f, h)), w(ks[4], (1, h), 0.02),
        jnp.ones((1, h), jnp.float32), w(ks[5], (1, h), 0.02),
        w(ks[6], (h, 1)), w(ks[7], (1, 1), 0.02),
        # disease_shared
        w(ks[8], (f, f)), w(ks[9], (1, f), 0.02),
        jnp.ones((1, f), jnp.float32), w(ks[10], (1, f), 0.02),
        # disease_correlation (only V and out projections matter for L=1 attention)
        w(ks[11], (f, f)), w(ks[12], (1, f), 0.02),
        w(ks[13], (f, f)), w(ks[14], (1, f), 0.02),
        # disease_specific (stacked over the 7 heads)
        w(ks[15], (NUM_DISEASE, f, h)), w(ks[16], (NUM_DISEASE, 1, h), 0.02),
        jnp.ones((NUM_DISEASE, 1, h), jnp.float32), w(ks[17], (NUM_DISEASE, 1, h), 0.02),
        w(ks[18], (NUM_DISEASE, h, 1)), w(ks[19], (NUM_DISEASE, 1, 1), 0.02),
        # class_weights (nn.Parameter(torch.ones(num_classes)))
        jnp.ones((1, NUM_CLASSES), jnp.float32),
    )
    return params


def reference_forward(x, params):
    """Plain-JAX reference with the original per-layer math, for verification."""
    mm = functools.partial(jnp.dot, precision=jax.lax.Precision.HIGHEST)

    def layernorm(h, gamma, beta):
        mu = jnp.mean(h, axis=-1, keepdims=True)
        var = jnp.mean((h - mu) ** 2, axis=-1, keepdims=True)
        return (h - mu) * jax.lax.rsqrt(var + LN_EPS) * gamma + beta

    (fe_w, fe_b, fe_g, fe_bt,
     nb_w1, nb_b1, nb_g, nb_bt, nb_w2, nb_b2,
     ds_w, ds_b, ds_g, ds_bt,
     at_vw, at_vb, at_ow, at_ob,
     dsp_w1, dsp_b1, dsp_g, dsp_bt, dsp_w2, dsp_b2,
     cw) = params

    h = jnp.maximum(layernorm(mm(x, fe_w) + fe_b, fe_g, fe_bt), 0.0)
    n = jnp.maximum(layernorm(mm(h, nb_w1) + nb_b1, nb_g, nb_bt), 0.0)
    normal_logit = mm(n, nb_w2) + nb_b2
    d = jnp.maximum(layernorm(mm(h, ds_w) + ds_b, ds_g, ds_bt), 0.0)
    d = mm(mm(d, at_vw) + at_vb, at_ow) + at_ob
    logits = [normal_logit]
    for i in range(NUM_DISEASE):
        t = jnp.maximum(layernorm(mm(d, dsp_w1[i]) + dsp_b1[i], dsp_g[i], dsp_bt[i]), 0.0)
        logits.append(mm(t, dsp_w2[i]) + dsp_b2[i])
    return jnp.concatenate(logits, axis=1) * cw


if __name__ == "__main__":
    key = jax.random.PRNGKey(0)
    kx, kp = jax.random.split(key)
    batch = 8
    x = jax.random.normal(kx, (batch, IN_FEATURES), dtype=jnp.float32)

    params = init_params(kp)
    packed = pack_params(params)

    out = multi_head_disease_classifier(x, packed)
    out = jax.block_until_ready(out)

    ref = reference_forward(x, params)
    assert out.shape == (batch, NUM_CLASSES)
    assert jnp.allclose(out, ref, atol=2e-4, rtol=2e-4), \
        float(jnp.max(jnp.abs(out - ref)))

    print("KERNEL_OK")
</pallas_src>

<mosaic_0001>
module attributes {stable_mosaic.version = 11 : i64} {
  func.func @_classifier_kernel(%arg0: i32, %arg1: memref<8x32xf32, #tpu.memory_space<vmem>>, %arg2: memref<4x32x128xf32, #tpu.memory_space<vmem>>, %arg3: memref<128x8xf32, #tpu.memory_space<vmem>>, %arg4: memref<16x128xf32, #tpu.memory_space<vmem>>, %arg5: memref<112x112xf32, #tpu.memory_space<vmem>>, %arg6: memref<8x8xf32, #tpu.memory_space<vmem>>) attributes {dimension_semantics = [#tpu.dimension_semantics<parallel>], iteration_bounds = array<i64: 1>, scalar_prefetch = 0 : i64, scratch_operands = 0 : i64, tpu.core_type = #tpu.core_type<tc>, window_params = [{transform_indices = @transform_0, window_bounds = array<i64: 8, 32>}, {pipeline_mode = #tpu.pipeline_mode<synchronous>, transform_indices = @transform_1, window_bounds = array<i64: 4, 32, 128>}, {pipeline_mode = #tpu.pipeline_mode<synchronous>, transform_indices = @transform_2, window_bounds = array<i64: 128, 8>}, {pipeline_mode = #tpu.pipeline_mode<synchronous>, transform_indices = @transform_3, window_bounds = array<i64: 16, 128>}, {pipeline_mode = #tpu.pipeline_mode<synchronous>, transform_indices = @transform_4, window_bounds = array<i64: 112, 112>}, {transform_indices = @transform_5, window_bounds = array<i64: 8, 8>}]} {
    %c0 = arith.constant 0 : index
    %c0_0 = arith.constant 0 : index
    %0 = vector.load %arg1[%c0, %c0_0] : memref<8x32xf32, #tpu.memory_space<vmem>>, vector<8x32xf32>
    %c0_1 = arith.constant 0 : index
    %c0_2 = arith.constant 0 : index
    %c0_3 = arith.constant 0 : index
    %1 = vector.load %arg2[%c0_1, %c0_2, %c0_3] : memref<4x32x128xf32, #tpu.memory_space<vmem>>, vector<1x32x128xf32>
    %2 = vector.shape_cast %1 : vector<1x32x128xf32> to vector<32x128xf32>
    %3 = vector.extract_strided_slice %2 {offsets = [0, 0], sizes = [32, 32], strides = [1, 1]} : vector<32x128xf32> to vector<32x32xf32>
    %cst = arith.constant dense<0.000000e+00> : vector<8x32xf32>
    %4 = tpu.matmul %0, %3, %cst {dimension_numbers = #tpu.dot_dimension_numbers<[1], [0], [0], [1], [0, 0, 1, 1], [], []>} : vector<8x32xf32>, vector<32x32xf32>, vector<8x32xf32> -> vector<8x32xf32>
    %c0_4 = arith.constant 0 : index
    %c0_5 = arith.constant 0 : index
    %5 = vector.load %arg4[%c0_4, %c0_5] : memref<16x128xf32, #tpu.memory_space<vmem>>, vector<1x32xf32>
    %6 = vector.broadcast %5 : vector<1x32xf32> to vector<8x32xf32>
    %7 = arith.addf %4, %6 : vector<8x32xf32>
    %cst_6 = arith.constant dense<0.000000e+00> : vector<8xf32>
    %8 = vector.multi_reduction <add>, %7, %cst_6 [1] : vector<8x32xf32> to vector<8xf32>
    %9 = vector.shape_cast %8 : vector<8xf32> to vector<8x1xf32>
    %cst_7 = arith.constant 3.200000e+01 : f32
    %10 = vector.broadcast %cst_7 : f32 to vector<8x1xf32>
    %11 = arith.divf %9, %10 : vector<8x1xf32>
    %12 = vector.broadcast %11 : vector<8x1xf32> to vector<8x32xf32>
    %13 = arith.subf %7, %12 : vector<8x32xf32>
    %14 = arith.mulf %13, %13 : vector<8x32xf32>
    %cst_8 = arith.constant dense<0.000000e+00> : vector<8xf32>
    %15 = vector.multi_reduction <add>, %14, %cst_8 [1] : vector<8x32xf32> to vector<8xf32>
    %16 = vector.shape_cast %15 : vector<8xf32> to vector<8x1xf32>
    %cst_9 = arith.constant 3.200000e+01 : f32
    %17 = vector.broadcast %cst_9 : f32 to vector<8x1xf32>
    %18 = arith.divf %16, %17 : vector<8x1xf32>
    %19 = vector.broadcast %11 : vector<8x1xf32> to vector<8x32xf32>
    %20 = arith.subf %7, %19 : vector<8x32xf32>
    %cst_10 = arith.constant 9.99999974E-6 : f32
    %21 = vector.broadcast %cst_10 : f32 to vector<8x1xf32>
    %22 = arith.addf %18, %21 : vector<8x1xf32>
    %23 = math.rsqrt %22 : vector<8x1xf32>
    %24 = vector.broadcast %23 : vector<8x1xf32> to vector<8x32xf32>
    %25 = arith.mulf %20, %24 : vector<8x32xf32>
    %c1 = arith.constant 1 : index
    %c0_11 = arith.constant 0 : index
    %26 = vector.load %arg4[%c1, %c0_11] : memref<16x128xf32, #tpu.memory_space<vmem>>, vector<1x32xf32>
    %27 = vector.broadcast %26 : vector<1x32xf32> to vector<8x32xf32>
    %28 = arith.mulf %25, %27 : vector<8x32xf32>
    %c2 = arith.constant 2 : index
    %c0_12 = arith.constant 0 : index
    %29 = vector.load %arg4[%c2, %c0_12] : memref<16x128xf32, #tpu.memory_space<vmem>>, vector<1x32xf32>
    %30 = vector.broadcast %29 : vector<1x32xf32> to vector<8x32xf32>
    %31 = arith.addf %28, %30 : vector<8x32xf32>
    %cst_13 = arith.constant 0.000000e+00 : f32
    %32 = vector.broadcast %cst_13 : f32 to vector<8x32xf32>
    %33 = arith.maximumf %31, %32 : vector<8x32xf32>
    %c1_14 = arith.constant 1 : index
    %c0_15 = arith.constant 0 : index
    %c0_16 = arith.constant 0 : index
    %34 = vector.load %arg2[%c1_14, %c0_15, %c0_16] : memref<4x32x128xf32, #tpu.memory_space<vmem>>, vector<1x32x128xf32>
    %35 = vector.shape_cast %34 : vector<1x32x128xf32> to vector<32x128xf32>
    %36 = vector.extract_strided_slice %35 {offsets = [0, 0], sizes = [32, 16], strides = [1, 1]} : vector<32x128xf32> to vector<32x16xf32>
    %cst_17 = arith.constant dense<0.000000e+00> : vector<8x16xf32>
    %37 = tpu.matmul %33, %36, %cst_17 {dimension_numbers = #tpu.dot_dimension_numbers<[1], [0], [0], [1], [0, 0, 1, 1], [], []>} : vector<8x32xf32>, vector<32x16xf32>, vector<8x16xf32> -> vector<8x16xf32>
    %c3 = arith.constant 3 : index
    %c0_18 = arith.constant 0 : index
    %38 = vector.load %arg4[%c3, %c0_18] : memref<16x128xf32, #tpu.memory_space<vmem>>, vector<1x16xf32>
    %39 = vector.broadcast %38 : vector<1x16xf32> to vector<8x16xf32>
    %40 = arith.addf %37, %39 : vector<8x16xf32>
    %cst_19 = arith.constant dense<0.000000e+00> : vector<8xf32>
    %41 = vector.multi_reduction <add>, %40, %cst_19 [1] : vector<8x16xf32> to vector<8xf32>
    %42 = vector.shape_cast %41 : vector<8xf32> to vector<8x1xf32>
    %cst_20 = arith.constant 1.600000e+01 : f32
    %43 = vector.broadcast %cst_20 : f32 to vector<8x1xf32>
    %44 = arith.divf %42, %43 : vector<8x1xf32>
    %45 = vector.broadcast %44 : vector<8x1xf32> to vector<8x16xf32>
    %46 = arith.subf %40, %45 : vector<8x16xf32>
    %47 = arith.mulf %46, %46 : vector<8x16xf32>
    %cst_21 = arith.constant dense<0.000000e+00> : vector<8xf32>
    %48 = vector.multi_reduction <add>, %47, %cst_21 [1] : vector<8x16xf32> to vector<8xf32>
    %49 = vector.shape_cast %48 : vector<8xf32> to vector<8x1xf32>
    %cst_22 = arith.constant 1.600000e+01 : f32
    %50 = vector.broadcast %cst_22 : f32 to vector<8x1xf32>
    %51 = arith.divf %49, %50 : vector<8x1xf32>
    %52 = vector.broadcast %44 : vector<8x1xf32> to vector<8x16xf32>
    %53 = arith.subf %40, %52 : vector<8x16xf32>
    %cst_23 = arith.constant 9.99999974E-6 : f32
    %54 = vector.broadcast %cst_23 : f32 to vector<8x1xf32>
    %55 = arith.addf %51, %54 : vector<8x1xf32>
    %56 = math.rsqrt %55 : vector<8x1xf32>
    %57 = vector.broadcast %56 : vector<8x1xf32> to vector<8x16xf32>
    %58 = arith.mulf %53, %57 : vector<8x16xf32>
    %c4 = arith.constant 4 : index
    %c0_24 = arith.constant 0 : index
    %59 = vector.load %arg4[%c4, %c0_24] : memref<16x128xf32, #tpu.memory_space<vmem>>, vector<1x16xf32>
    %60 = vector.broadcast %59 : vector<1x16xf32> to vector<8x16xf32>
    %61 = arith.mulf %58, %60 : vector<8x16xf32>
    %c5 = arith.constant 5 : index
    %c0_25 = arith.constant 0 : index
    %62 = vector.load %arg4[%c5, %c0_25] : memref<16x128xf32, #tpu.memory_space<vmem>>, vector<1x16xf32>
    %63 = vector.broadcast %62 : vector<1x16xf32> to vector<8x16xf32>
    %64 = arith.addf %61, %63 : vector<8x16xf32>
    %cst_26 = arith.constant 0.000000e+00 : f32
    %65 = vector.broadcast %cst_26 : f32 to vector<8x16xf32>
    %66 = arith.maximumf %64, %65 : vector<8x16xf32>
    %c2_27 = arith.constant 2 : index
    %c0_28 = arith.constant 0 : index
    %c0_29 = arith.constant 0 : index
    %67 = vector.load %arg2[%c2_27, %c0_28, %c0_29] : memref<4x32x128xf32, #tpu.memory_space<vmem>>, vector<1x32x128xf32>
    %68 = vector.shape_cast %67 : vector<1x32x128xf32> to vector<32x128xf32>
    %69 = vector.extract_strided_slice %68 {offsets = [0, 0], sizes = [32, 32], strides = [1, 1]} : vector<32x128xf32> to vector<32x32xf32>
    %cst_30 = arith.constant dense<0.000000e+00> : vector<8x32xf32>
    %70 = tpu.matmul %33, %69, %cst_30 {dimension_numbers = #tpu.dot_dimension_numbers<[1], [0], [0], [1], [0, 0, 1, 1], [], []>} : vector<8x32xf32>, vector<32x32xf32>, vector<8x32xf32> -> vector<8x32xf32>
    %c6 = arith.constant 6 : index
    %c0_31 = arith.constant 0 : index
    %71 = vector.load %arg4[%c6, %c0_31] : memref<16x128xf32, #tpu.memory_space<vmem>>, vector<1x32xf32>
    %72 = vector.broadcast %71 : vector<1x32xf32> to vector<8x32xf32>
    %73 = arith.addf %70, %72 : vector<8x32xf32>
    %cst_32 = arith.constant dense<0.000000e+00> : vector<8xf32>
    %74 = vector.multi_reduction <add>, %73, %cst_32 [1] : vector<8x32xf32> to vector<8xf32>
    %75 = vector.shape_cast %74 : vector<8xf32> to vector<8x1xf32>
    %cst_33 = arith.constant 3.200000e+01 : f32
    %76 = vector.broadcast %cst_33 : f32 to vector<8x1xf32>
    %77 = arith.divf %75, %76 : vector<8x1xf32>
    %78 = vector.broadcast %77 : vector<8x1xf32> to vector<8x32xf32>
    %79 = arith.subf %73, %78 : vector<8x32xf32>
    %80 = arith.mulf %79, %79 : vector<8x32xf32>
    %cst_34 = arith.constant dense<0.000000e+00> : vector<8xf32>
    %81 = vector.multi_reduction <add>, %80, %cst_34 [1] : vector<8x32xf32> to vector<8xf32>
    %82 = vector.shape_cast %81 : vector<8xf32> to vector<8x1xf32>
    %cst_35 = arith.constant 3.200000e+01 : f32
    %83 = vector.broadcast %cst_35 : f32 to vector<8x1xf32>
    %84 = arith.divf %82, %83 : vector<8x1xf32>
    %85 = vector.broadcast %77 : vector<8x1xf32> to vector<8x32xf32>
    %86 = arith.subf %73, %85 : vector<8x32xf32>
    %cst_36 = arith.constant 9.99999974E-6 : f32
    %87 = vector.broadcast %cst_36 : f32 to vector<8x1xf32>
    %88 = arith.addf %84, %87 : vector<8x1xf32>
    %89 = math.rsqrt %88 : vector<8x1xf32>
    %90 = vector.broadcast %89 : vector<8x1xf32> to vector<8x32xf32>
    %91 = arith.mulf %86, %90 : vector<8x32xf32>
    %c7 = arith.constant 7 : index
    %c0_37 = arith.constant 0 : index
    %92 = vector.load %arg4[%c7, %c0_37] : memref<16x128xf32, #tpu.memory_space<vmem>>, vector<1x32xf32>
    %93 = vector.broadcast %92 : vector<1x32xf32> to vector<8x32xf32>
    %94 = arith.mulf %91, %93 : vector<8x32xf32>
    %c8 = arith.constant 8 : index
    %c0_38 = arith.constant 0 : index
    %95 = vector.load %arg4[%c8, %c0_38] : memref<16x128xf32, #tpu.memory_space<vmem>>, vector<1x32xf32>
    %96 = vector.broadcast %95 : vector<1x32xf32> to vector<8x32xf32>
    %97 = arith.addf %94, %96 : vector<8x32xf32>
    %cst_39 = arith.constant 0.000000e+00 : f32
    %98 = vector.broadcast %cst_39 : f32 to vector<8x32xf32>
    %99 = arith.maximumf %97, %98 : vector<8x32xf32>
    %c3_40 = arith.constant 3 : index
    %c0_41 = arith.constant 0 : index
    %c0_42 = arith.constant 0 : index
    %100 = vector.load %arg2[%c3_40, %c0_41, %c0_42] : memref<4x32x128xf32, #tpu.memory_space<vmem>>, vector<1x32x128xf32>
    %101 = vector.shape_cast %100 : vector<1x32x128xf32> to vector<32x128xf32>
    %102 = vector.extract_strided_slice %101 {offsets = [0, 0], sizes = [32, 112], strides = [1, 1]} : vector<32x128xf32> to vector<32x112xf32>
    %cst_43 = arith.constant dense<0.000000e+00> : vector<8x112xf32>
    %103 = tpu.matmul %99, %102, %cst_43 {dimension_numbers = #tpu.dot_dimension_numbers<[1], [0], [0], [1], [0, 0, 1, 1], [], []>} : vector<8x32xf32>, vector<32x112xf32>, vector<8x112xf32> -> vector<8x112xf32>
    %c9 = arith.constant 9 : index
    %c0_44 = arith.constant 0 : index
    %104 = vector.load %arg4[%c9, %c0_44] : memref<16x128xf32, #tpu.memory_space<vmem>>, vector<1x112xf32>
    %105 = vector.broadcast %104 : vector<1x112xf32> to vector<8x112xf32>
    %106 = arith.addf %103, %105 : vector<8x112xf32>
    %c0_45 = arith.constant 0 : index
    %c0_46 = arith.constant 0 : index
    %107 = vector.load %arg5[%c0_45, %c0_46] : memref<112x112xf32, #tpu.memory_space<vmem>>, vector<112x112xf32>
    %cst_47 = arith.constant dense<0.000000e+00> : vector<8x112xf32>
    %108 = tpu.matmul %106, %107, %cst_47 {dimension_numbers = #tpu.dot_dimension_numbers<[1], [0], [0], [1], [0, 0, 1, 1], [], []>} : vector<8x112xf32>, vector<112x112xf32>, vector<8x112xf32> -> vector<8x112xf32>
    %109 = arith.subf %106, %108 : vector<8x112xf32>
    %110 = arith.mulf %109, %109 : vector<8x112xf32>
    %cst_48 = arith.constant dense<0.000000e+00> : vector<8x112xf32>
    %111 = tpu.matmul %110, %107, %cst_48 {dimension_numbers = #tpu.dot_dimension_numbers<[1], [0], [0], [1], [0, 0, 1, 1], [], []>} : vector<8x112xf32>, vector<112x112xf32>, vector<8x112xf32> -> vector<8x112xf32>
    %cst_49 = arith.constant 9.99999974E-6 : f32
    %112 = vector.broadcast %cst_49 : f32 to vector<8x112xf32>
    %113 = arith.addf %111, %112 : vector<8x112xf32>
    %114 = math.rsqrt %113 : vector<8x112xf32>
    %115 = arith.mulf %109, %114 : vector<8x112xf32>
    %c10 = arith.constant 10 : index
    %c0_50 = arith.constant 0 : index
    %116 = vector.load %arg4[%c10, %c0_50] : memref<16x128xf32, #tpu.memory_space<vmem>>, vector<1x112xf32>
    %117 = vector.broadcast %116 : vector<1x112xf32> to vector<8x112xf32>
    %118 = arith.mulf %115, %117 : vector<8x112xf32>
    %c11 = arith.constant 11 : index
    %c0_51 = arith.constant 0 : index
    %119 = vector.load %arg4[%c11, %c0_51] : memref<16x128xf32, #tpu.memory_space<vmem>>, vector<1x112xf32>
    %120 = vector.broadcast %119 : vector<1x112xf32> to vector<8x112xf32>
    %121 = arith.addf %118, %120 : vector<8x112xf32>
    %cst_52 = arith.constant 0.000000e+00 : f32
    %122 = vector.broadcast %cst_52 : f32 to vector<8x112xf32>
    %123 = arith.maximumf %121, %122 : vector<8x112xf32>
    %c0_53 = arith.constant 0 : index
    %c0_54 = arith.constant 0 : index
    %124 = vector.load %arg3[%c0_53, %c0_54] : memref<128x8xf32, #tpu.memory_space<vmem>>, vector<128x8xf32>
    %125 = vector.extract_strided_slice %124 {offsets = [0, 0], sizes = [16, 8], strides = [1, 1]} : vector<128x8xf32> to vector<16x8xf32>
    %cst_55 = arith.constant dense<0.000000e+00> : vector<8x8xf32>
    %126 = tpu.matmul %66, %125, %cst_55 {dimension_numbers = #tpu.dot_dimension_numbers<[1], [0], [0], [1], [0, 0, 1, 1], [], []>} : vector<8x16xf32>, vector<16x8xf32>, vector<8x8xf32> -> vector<8x8xf32>
    %127 = vector.extract_strided_slice %124 {offsets = [16, 0], sizes = [112, 8], strides = [1, 1]} : vector<128x8xf32> to vector<112x8xf32>
    %cst_56 = arith.constant dense<0.000000e+00> : vector<8x8xf32>
    %128 = tpu.matmul %123, %127, %cst_56 {dimension_numbers = #tpu.dot_dimension_numbers<[1], [0], [0], [1], [0, 0, 1, 1], [], []>} : vector<8x112xf32>, vector<112x8xf32>, vector<8x8xf32> -> vector<8x8xf32>
    %129 = arith.addf %126, %128 : vector<8x8xf32>
    %c12 = arith.constant 12 : index
    %c0_57 = arith.constant 0 : index
    %130 = vector.load %arg4[%c12, %c0_57] : memref<16x128xf32, #tpu.memory_space<vmem>>, vector<1x8xf32>
    %131 = vector.broadcast %130 : vector<1x8xf32> to vector<8x8xf32>
    %132 = arith.addf %129, %131 : vector<8x8xf32>
    %c0_58 = arith.constant 0 : index
    %c0_59 = arith.constant 0 : index
    %133 = vector.load %arg6[%c0_58, %c0_59] : memref<8x8xf32, #tpu.memory_space<vmem>>, vector<8x8xf32>
    tpu.vector_store %arg6[%c0_58, %c0_59], %132 {strides = array<i32>} : memref<8x8xf32, #tpu.memory_space<vmem>>, vector<8x8xf32>,
    return
  }
  func.func @transform_0(%arg0: i32) -> (i32, i32) {
    %c0_i32 = arith.constant 0 : i32
    %c0_i32_0 = arith.constant 0 : i32
    return %arg0, %c0_i32 : i32, i32
  }
  func.func @transform_1(%arg0: i32) -> (i32, i32, i32) {
    %c0_i32 = arith.constant 0 : i32
    %c0_i32_0 = arith.constant 0 : i32
    %c0_i32_1 = arith.constant 0 : i32
    %c0_i32_2 = arith.constant 0 : i32
    return %c0_i32, %c0_i32_0, %c0_i32_1 : i32, i32, i32
  }
  func.func @transform_2(%arg0: i32) -> (i32, i32) {
    %c0_i32 = arith.constant 0 : i32
    %c0_i32_0 = arith.constant 0 : i32
    %c0_i32_1 = arith.constant 0 : i32
    return %c0_i32, %c0_i32_0 : i32, i32
  }
  func.func @transform_3(%arg0: i32) -> (i32, i32) {
    %c0_i32 = arith.constant 0 : i32
    %c0_i32_0 = arith.constant 0 : i32
    %c0_i32_1 = arith.constant 0 : i32
    return %c0_i32, %c0_i32_0 : i32, i32
  }
  func.func @transform_4(%arg0: i32) -> (i32, i32) {
    %c0_i32 = arith.constant 0 : i32
    %c0_i32_0 = arith.constant 0 : i32
    %c0_i32_1 = arith.constant 0 : i32
    return %c0_i32, %c0_i32_0 : i32, i32
  }
  func.func @transform_5(%arg0: i32) -> (i32, i32) {
    %c0_i32 = arith.constant 0 : i32
    %c0_i32_0 = arith.constant 0 : i32
    return %arg0, %c0_i32 : i32, i32
  }
}

</mosaic_0001>

<bundles_post_ra>
// kernel: tpu_custom_call.1
= control target key start
LH: loop header
LB: loop body
LE: loop exit
PB: predicated region body
PF: predicated region fallthrough
CT: control target
= control target key end

     0   :  { %10 = vsyncpa [#allocation3], 0  ;;  %s1526_s0 = inlined_call_operand.hbm [shape: f32[8,32], index: 0, kind: input, shape index: {}]   ;;  %s1527_s1 = inlined_call_operand.vmem [shape: f32[4,32,128], index: 1, kind: input, shape index: {}]   ;;  %s1528_s2 = inlined_call_operand.vmem [shape: f32[128,8], index: 2, kind: input, shape index: {}]   ;;  %s1529_s3 = inlined_call_operand.vmem [shape: f32[16,128], index: 3, kind: input, shape index: {}]   ;;  %s1530_s4 = inlined_call_operand.hbm [shape: f32[112,112], index: 4, kind: input, shape index: {}]   ;;  %s1531_s5 = inlined_call_operand.hbm [shape: f32[8,8], index: 5, kind: output, shape index: {}]  }
   0x1   :  { %11 = vsyncpa [#allocation6], 0 }
   0x2   :  { %12 = vsyncpa [#allocation4], 0  ;;  %s1245_s18 = smov [#allocation2]   ;;  %s1246_s20 = smov [#allocation5]  }
   0x3   :  { %s19_s19 = sshll.u32 %s1245_s18, 4  ;;  %s34_s21 = sshll.u32 %s1246_s20, 4  ;;  %s20_s19 = int_to_ptr.vmem [resolvable:$true] %s19_s19  ;;  %s1283_s21 = int_to_ptr.vmem [resolvable:$true] %s34_s21 }
   0x4   :  { %s1173_s24 = scalar_lea.hbm %s1526_s0, 128 }
   0x5   :  { %p1174_p0 = scmp.ne.s32.totalorder %s1526_s0, %s1173_s24  ;;  %p1177_p1 = scmp.lt.u32.totalorder %s1173_s24, %s1526_s0 }
   0x7   :  { %p1179_p2 = pnand %p1177_p1, %p1174_p0 }
   0x9   :  { %1182 = shalt.err (!%p1179_p2)
}
   0xa   :  { %s1183_s29 = scalar_lea.vmem %s20_s19, 128  ;;  %p1188_p4 = scmp.lt.s32.totalorder %s20_s19, %s20_s19 }
   0xb   :  { %p1184_p3 = scmp.ne.s32.totalorder %s20_s19, %s1183_s29  ;;  %p1189_p5 = scmp.lt.s32.totalorder %s1183_s29, %s1183_s29 }
   0xd   :  { %p1190_p6 = por %p1189_p5, %p1188_p4 }
   0xf   :  { %p1191_p7 = pnand %p1190_p6, %p1184_p3 }
  0x11   :  { %1194 = shalt.err (!%p1191_p7)
}
  0x12   :  { %22 = dma.hbm_to_vmem [thread:$0]  %s1526_s0, 128, %s20_s19, [#allocation3]  }
  0x13   :  { %s1195_s9 = scalar_lea.hbm %s1530_s4, 1792 }
  0x14   :  { %p1196_p8 = scmp.ne.s32.totalorder %s1530_s4, %s1195_s9  ;;  %p1199_p9 = scmp.lt.u32.totalorder %s1195_s9, %s1530_s4 }
  0x16   :  { %p1201_p10 = pnand %p1199_p9, %p1196_p8 }
  0x18   :  { %1204 = shalt.err (!%p1201_p10)
}
  0x19   :  { %s1205_s14 = scalar_lea.vmem %s1283_s21, 1792  ;;  %p1210_p12 = scmp.lt.s32.totalorder %s1283_s21, %s1283_s21 }
  0x1a   :  { %p1206_p11 = scmp.ne.s32.totalorder %s1283_s21, %s1205_s14  ;;  %p1211_p13 = scmp.lt.s32.totalorder %s1205_s14, %s1205_s14 }
  0x1c   :  { %p1212_p0 = por %p1211_p13, %p1210_p12 }
  0x1e   :  { %p1213_p1 = pnand %p1212_p0, %p1206_p11 }
  0x20   :  { %1216 = shalt.err (!%p1213_p1)
}
  0x21   :  { %s1247_s0 = smov 128   ;;  %s1248_s15 = smov 8  }
  0x22   :  { %40 = dma.hbm_to_vmem [thread:$0]  %s1530_s4, 1792, %s1283_s21, [#allocation6], %s1247_s0, %s1247_s0, %s1248_s15  }
  0x23   :  { %1239 = dma.done.wait [#allocation3], 128  }
  0x24   :  { %1240 = vsyncadd [#allocation3], 4294967168 }
  0x25   :  { %1241 = dma.done.wait [#allocation6], 1792  }
  0x26   :  { %1242 = vsyncadd [#allocation6], 4294965504  ;;  %v1249_v0 = vmov 0.0|0.0   ;;  %vm1250_vm0 = vmmov 0   ;;  %v1251_v1 = vmov 0.0   ;;  %v48_v2 = vld [vmem:[%s1527_s1] sm:$0xff] }
  0x27   :  { %1067 = vmatprep.subr.bf16.mxu1 %v1249_v0  ;;  %931 = vmatprep.mubr.msk.f32.mxu1 %vm1250_vm0, %v1251_v1  ;;  %v49_v3 = vld [vmem:[%s1527_s1 + $0x8] sm:$0xff]  ;;  %v50_v4 = vld [vmem:[%s1527_s1 + $0x10] sm:$0xff]  ;;  %v51_v6 = vld [vmem:[%s1527_s1 + $0x18] sm:$0xff]  ;;  %vm57_vm1 = vcmask 261120   ;;  %vm241_vm2 = vcmask 130048   ;;  %vm472_vm3 = vcmask 916480  }
  0x28   :  { %1079 = vmatprep.subr.bf16.mxu0 %v1249_v0  ;;  %953 = vmatprep.mubr.msk.f32.mxu0 %vm1250_vm0, %v1251_v1  ;;  %v1068_v5 = vpack.c.bf16 %v49_v3, %v48_v2  ;;  %v1071_v7 = vpack.c.bf16 %v51_v6, %v50_v4  ;;  %v47_v8 = vld [vmem:[#allocation2] sm:$0xff]  ;;  %v827_v20 = vld [vmem:[%s1527_s1 + $0x28] sm:$0xff]  ;;  %v828_v25 = vld [vmem:[%s1527_s1 + $0x30] sm:$0xff]  ;;  %s1252_s23 = smov [#allocation7]   ;;  %vm804_vm4 = vcmask 64512  }
  0x29   :  { %v822_v9 = vld [vmem:[%s1529_s3] ss:$0 sm:$0xff]  ;;  %v835_v23 = vld [vmem:[%s1527_s1 + $0x48] sm:$0xff]  ;;  %v829_v26 = vld [vmem:[%s1527_s1 + $0x38] sm:$0xff]  ;;  %s812_s24 = sshll.u32 %s1252_s23, 4  ;;  %s813_s24 = int_to_ptr.vmem [resolvable:$true] %s812_s24 }
  0x2a   :  { %1069 = vmatpush3.bf16.msra.mxu1 %v1068_v5  ;;  %v826_v19 = vld [vmem:[%s1527_s1 + $0x20] sm:$0xff]  ;;  %v836_v27 = vld [vmem:[%s1527_s1 + $0x50] sm:$0xff]  ;;  %v1077_v28 = vpack.c.bf16 %v829_v26, %v828_v25  ;;  %v837_v29 = vld [vmem:[%s1527_s1 + $0x58] sm:$0xff]  ;;  %s1217_s25 = scalar_lea.vmem %s813_s24, 128  ;;  %p1222_p3 = scmp.lt.s32.totalorder %s813_s24, %s813_s24 }
  0x2b   :  { %1070 = vmatprep.subr.bf16.mxu1 %v1249_v0  ;;  %v834_v21 = vld [vmem:[%s1527_s1 + $0x40] sm:$0xff]  ;;  %v1074_v22 = vpack.c.bf16 %v827_v20, %v826_v19  ;;  %v1083_v30 = vpack.c.bf16 %v837_v29, %v836_v27  ;;  %v843_v62 = vld [vmem:[%s1527_s1 + $0x68] sm:$0xff]  ;;  %v844_v2 = vld [vmem:[%s1527_s1 + $0x70] sm:$0xff]  ;;  %p1218_p2 = scmp.ne.s32.totalorder %s813_s24, %s1217_s25  ;;  %p1223_p4 = scmp.lt.s32.totalorder %s1217_s25, %s1217_s25 }
  0x2c   :  { %v1080_v24 = vpack.c.bf16 %v835_v23, %v834_v21  ;;  %v824_v35 = vld [vmem:[%s1529_s3 + $0x1] ss:$0 sm:$0xff]  ;;  %v825_v37 = vld [vmem:[%s1529_s3 + $0x2] ss:$0 sm:$0xff]  ;;  %v830_v41 = vld [vmem:[%s1529_s3 + $0x3] ss:$0 sm:$0xff] }
  0x2d   :  { %v838_v42 = vld [vmem:[%s1529_s3 + $0x6] ss:$0 sm:$0xff]  ;;  %v845_v3 = vld [vmem:[%s1527_s1 + $0x78] sm:$0xff]  ;;  %v458_v5 = vld [vmem:[#allocation5] sm:$0xff]  ;;  %p1224_p5 = por %p1223_p4, %p1222_p3 }
  0x2e   :  { %1072 = vmatpush3.bf16.msra.mxu1 %v1071_v7  ;;  %1081 = vmatpush3.bf16.msra.mxu0 %v1080_v24  ;;  %v842_v61 = vld [vmem:[%s1527_s1 + $0x60] sm:$0xff]  ;;  %v1089_v4 = vpack.c.bf16 %v845_v3, %v844_v2  ;;  %v459_v6 = vld [vmem:[#allocation5 + $0x8] sm:$0xff]  ;;  %v460_v7 = vld [vmem:[#allocation5 + $0x10] sm:$0xff] }
  0x2f   :  { %1073 = vmatprep.subr.bf16.mxu1 %v1249_v0  ;;  %1082 = vmatprep.subr.bf16.mxu0 %v1249_v0  ;;  %v1086_v63 = vpack.c.bf16 %v843_v62, %v842_v61  ;;  %v468_v20 = vld [vmem:[#allocation5 + $0x50] sm:$0xff]  ;;  %v469_v21 = vld [vmem:[#allocation5 + $0x58] sm:$0xff]  ;;  %v841_v29 = vld [vmem:[%s1529_s3 + $0x8] ss:$0 sm:$0xff]  ;;  %p1225_p6 = pnand %p1224_p5, %p1218_p2 }
  0x30   :  { %v840_v27 = vld [vmem:[%s1529_s3 + $0x7] ss:$0 sm:$0xff]  ;;  %v643_v2 = vld [vmem:[%s1528_s2 + $0x38] sm:$0xff] }
  0x31   :  { %932 = vmatmul.mubr.msk.f32.vlgmr.msra.gmra.mrb[0].mxu1 %vm57_vm1, %v47_v8  ;;  %v1092_v8 = vpack.c.bf16 %v459_v6, %v458_v5  ;;  %v646_v6 = vld [vmem:[%s1528_s2 + $0x50] sm:$0xff] }
  0x32   :  { %942 = vmatprep.mubr.msk.f32.mxu1 %vm1250_vm0, %v1251_v1  ;;  %1075 = vmatpush3.bf16.msra.mxu1 %v1074_v22  ;;  %v1107_v22 = vpack.c.bf16 %v469_v21, %v468_v20 }
  0x33   :  { %1076 = vmatprep.subr.bf16.mxu1 %v1249_v0  ;;  %1084 = vmatpush3.bf16.msra.mxu0 %v1083_v30 }
  0x34   :  { %1091 = vmatprep.subr.bf16.mxu0 %v1249_v0 }
  0x36   :  { %1078 = vmatpush3.bf16.msra.mxu1 %v1077_v28 }
  0x37   :  { %1085 = vmatprep.subr.bf16.mxu1 %v1249_v0 }
 0x104   :  { %v127_v10 = vpop.f32.mrb[0].mxu1 }
 0x105   :  { %v128_v11 = vadd.f32 %v822_v9, %v127_v10  ;;  %v933_v12 = vpop.f32.mrb[1].mxu1  ;;  %v461_v9 = vld [vmem:[#allocation5 + $0x18] sm:$0xff] }
 0x106   :  { %v1095_v10 = vpack.c.bf16 %v461_v9, %v460_v7  ;;  %v463_v12 = vld [vmem:[#allocation5 + $0x28] sm:$0xff]  ;;  %v647_v7 = vld [vmem:[%s1528_s2 + $0x58] sm:$0xff]  ;;  %v648_v9 = vld [vmem:[%s1528_s2 + $0x60] sm:$0xff] }
 0x107   :  { %v131_v13 = vsel %vm57_vm1, %v128_v11, 0.0 }
 0x108   :  { %132 = vadd.xlane.f32.xlu0 %v131_v13 }
 0x195   :  { %v133_v14 = vpop.xlane.xlu0 %132 }
 0x196   :  { %v135_v15 = vmul.f32 0.03125, %v133_v14  ;;  %v464_v14 = vld [vmem:[#allocation5 + $0x30] sm:$0xff] }
 0x198   :  { %v136_v16 = vsub.f32 %v128_v11, %v135_v15  ;;  %v462_v11 = vld [vmem:[#allocation5 + $0x20] sm:$0xff]  ;;  %v465_v15 = vld [vmem:[#allocation5 + $0x38] sm:$0xff] }
 0x199   :  { %v1098_v13 = vpack.c.bf16 %v463_v12, %v462_v11  ;;  %v650_v12 = vld [vmem:[%s1528_s2 + $0x70] sm:$0xff] }
 0x19a   :  { %v137_v17 = vmul.f32 %v136_v16, %v136_v16 }
 0x19c   :  { %v138_v18 = vsel %vm57_vm1, %v137_v17, 0.0  ;;  %v466_v17 = vld [vmem:[#allocation5 + $0x40] sm:$0xff] }
 0x19d   :  { %139 = vadd.xlane.f32.xlu0 %v138_v18  ;;  %v467_v18 = vld [vmem:[#allocation5 + $0x48] sm:$0xff] }
 0x19e   :  { %v1104_v19 = vpack.c.bf16 %v467_v18, %v466_v17 }
 0x22a   :  { %v140_v31 = vpop.xlane.xlu0 %139 }
 0x22b   :  { %v141_v32 = vmul.f32 0.03125, %v140_v31 }
 0x22d   :  { %v142_v33 = vadd.f32 1e-05, %v141_v32 }
 0x22f   :  { %1165 = vrsqrt.f32 %v142_v33  ;;  %v470_v33 = vld [vmem:[#allocation5 + $0x60] sm:$0xff] }
 0x239   :  { %v1166_v34 = vpop.eup %1165 }
 0x23a   :  { %v144_v36 = vmul.f32 %v1166_v34, %v136_v16  ;;  %v1101_v16 = vpack.c.bf16 %v465_v15, %v464_v14  ;;  %v471_v34 = vld [vmem:[#allocation5 + $0x68] sm:$0xff] }
 0x23c   :  { %v150_v38 = vmul.f32 %v824_v35, %v144_v36  ;;  %v1110_v35 = vpack.c.bf16 %v471_v34, %v470_v33  ;;  %v846_v36 = vld [vmem:[%s1529_s3 + $0x9] ss:$0 sm:$0xff] }
 0x23e   :  { %v156_v39 = vadd.f32 %v825_v37, %v150_v38 }
 0x240   :  { %v157_v40 = vmax.f32 %v156_v39, 0.0 }
 0x242   :  { %943 = vmatmul.mubr.msk.f32.vlgmr.msra.gmra.mrb[2].mxu1 %vm57_vm1, %v157_v40  ;;  %954 = vmatmul.mubr.msk.f32.vlgmr.msra.gmra.mrb[0].mxu0 %vm57_vm1, %v157_v40  ;;  %v638_v40 = vld [vmem:[%s1528_s2 + $0x10] sm:$0xff] }
 0x243   :  { %964 = vmatprep.mubr.msk.f32.mxu1 %vm1250_vm0, %v1251_v1  ;;  %995 = vmatprep.mubr.msk.f32.mxu0 %vm1250_vm0, %v1251_v1 }
 0x244   :  { %1087 = vmatpush3.bf16.msra.mxu1 %v1086_v63  ;;  %1093 = vmatpush3.bf16.msra.mxu0 %v1092_v8  ;;  %v642_v63 = vld [vmem:[%s1528_s2 + $0x30] sm:$0xff] }
 0x245   :  { %1088 = vmatprep.subr.bf16.mxu1 %v1249_v0  ;;  %1094 = vmatprep.subr.bf16.mxu0 %v1249_v0  ;;  %v1140_v3 = vpack.c.bf16 %v643_v2, %v642_v63 }
 0x248   :  { %1090 = vmatpush3.bf16.msra.mxu1 %v1089_v4  ;;  %1096 = vmatpush3.bf16.msra.mxu0 %v1095_v10  ;;  %v644_v4 = vld [vmem:[%s1528_s2 + $0x40] sm:$0xff] }
 0x249   :  { %1112 = vmatprep.subr.bf16.mxu1 %v1249_v0  ;;  %1097 = vmatprep.subr.bf16.mxu0 %v1249_v0 }
 0x24c   :  { %1099 = vmatpush3.bf16.msra.mxu0 %v1098_v13 }
 0x24d   :  { %1100 = vmatprep.subr.bf16.mxu0 %v1249_v0 }
 0x250   :  { %1102 = vmatpush3.bf16.msra.mxu0 %v1101_v16 }
 0x251   :  { %1103 = vmatprep.subr.bf16.mxu0 %v1249_v0 }
 0x254   :  { %1105 = vmatpush3.bf16.msra.mxu0 %v1104_v19 }
 0x255   :  { %1106 = vmatprep.subr.bf16.mxu0 %v1249_v0 }
 0x258   :  { %1108 = vmatpush3.bf16.msra.mxu0 %v1107_v22 }
 0x259   :  { %1109 = vmatprep.subr.bf16.mxu0 %v1249_v0 }
 0x25c   :  { %1111 = vmatpush3.bf16.msra.mxu0 %v1110_v35 }
 0x25d   :  { %1133 = vmatprep.subr.bf16.mxu0 %v1249_v0 }
 0x315   :  { %v237_v43 = vpop.f32.mrb[2].mxu1  ;;  %v345_v44 = vpop.f32.mrb[0].mxu0 }
 0x316   :  { %v238_v45 = vadd.f32 %v830_v41, %v237_v43  ;;  %v346_v46 = vadd.f32 %v838_v42, %v345_v44  ;;  %v944_v47 = vpop.f32.mrb[3].mxu1  ;;  %v955_v48 = vpop.f32.mrb[1].mxu0  ;;  %v639_v41 = vld [vmem:[%s1528_s2 + $0x18] sm:$0xff]  ;;  %v640_v42 = vld [vmem:[%s1528_s2 + $0x20] sm:$0xff]  ;;  %v641_v44 = vld [vmem:[%s1528_s2 + $0x28] sm:$0xff] }
 0x317   :  { %v1134_v43 = vpack.c.bf16 %v639_v41, %v638_v40 }
 0x318   :  { %v349_v49 = vsel %vm57_vm1, %v346_v46, 0.0  ;;  %v242_v50 = vsel %vm241_vm2, %v238_v45, 0.0 }
 0x319   :  { %350 = vadd.xlane.f32.xlu1 %v349_v49  ;;  %243 = vadd.xlane.f32.xlu0 %v242_v50 }
 0x3a6   :  { %v351_v51 = vpop.xlane.xlu1 %350  ;;  %v244_v52 = vpop.xlane.xlu0 %243 }
 0x3a7   :  { %v352_v53 = vmul.f32 0.03125, %v351_v51  ;;  %v246_v54 = vmul.f32 0.0625, %v244_v52  ;;  %v832_v51 = vld [vmem:[%s1529_s3 + $0x4] ss:$0 sm:$0xff] }
 0x3a9   :  { %v353_v55 = vsub.f32 %v346_v46, %v352_v53  ;;  %v1390_v56 = vsub.f32 %v238_v45, %v246_v54  ;;  %v1137_v45 = vpack.c.bf16 %v641_v44, %v640_v42  ;;  %v636_v53 = vld [vmem:[%s1528_s2] sm:$0xff]  ;;  %v637_v54 = vld [vmem:[%s1528_s2 + $0x8] sm:$0xff] }
 0x3ab   :  { %v354_v57 = vmul.f32 %v353_v55, %v353_v55  ;;  %v248_v59 = vmul.f32 %v1390_v56, %v1390_v56 }
 0x3ad   :  { %v355_v58 = vsel %vm57_vm1, %v354_v57, 0.0  ;;  %v249_v60 = vsel %vm241_vm2, %v248_v59, 0.0  ;;  %v833_v57 = vld [vmem:[%s1529_s3 + $0x5] ss:$0 sm:$0xff]  ;;  %v1155_v59 = vpack.c.bf16 %v637_v54, %v636_v53 }
 0x3ae   :  { %356 = vadd.xlane.f32.xlu1 %v355_v58 }
 0x3b2   :  { %250 = vadd.xlane.f32.xlu1 %v249_v60 }
 0x43b   :  { %v357_v23 = vpop.xlane.xlu1 %356 }
 0x43c   :  { %v358_v24 = vmul.f32 0.03125, %v357_v23 }
 0x43e   :  { %v359_v25 = vadd.f32 1e-05, %v358_v24 }
 0x43f   :  { %v251_v46 = vpop.xlane.xlu1 %250 }
 0x440   :  { %1167 = vrsqrt.f32 %v359_v25  ;;  %v252_v47 = vmul.f32 0.0625, %v251_v46 }
 0x442   :  { %v253_v48 = vadd.f32 1e-05, %v252_v47 }
 0x444   :  { %1169 = vrsqrt.f32 %v253_v48 }
 0x44a   :  { %v1168_v26 = vpop.eup %1167 }
 0x44b   :  { %v361_v28 = vmul.f32 %v1168_v26, %v353_v55 }
 0x44d   :  { %v367_v30 = vmul.f32 %v840_v27, %v361_v28  ;;  %v854_v27 = vld [vmem:[%s1529_s3 + $0xc] ss:$0 sm:$0xff] }
 0x44e   :  { %v1170_v49 = vpop.eup %1169 }
 0x44f   :  { %v373_v31 = vadd.f32 %v841_v29, %v367_v30  ;;  %v255_v50 = vmul.f32 %v1170_v49, %v1390_v56 }
 0x451   :  { %v374_v32 = vmax.f32 %v373_v31, 0.0  ;;  %v261_v52 = vmul.f32 %v832_v51, %v255_v50 }
 0x453   :  { %965 = vmatmul.mubr.msk.f32.vlgmr.msra.gmra.mrb[4].mxu1 %vm57_vm1, %v374_v32  ;;  %v267_v61 = vadd.f32 %v833_v57, %v261_v52 }
 0x454   :  { %1114 = vmatpush3.bf16.msra.mxu1 %v1092_v8  ;;  %1026 = vmatprep.mubr.msk.f32.mxu1 %vm1250_vm0, %v1251_v1  ;;  %v1146_v8 = vpack.c.bf16 %v647_v7, %v646_v6 }
 0x455   :  { %1115 = vmatprep.subr.bf16.mxu1 %v1249_v0  ;;  %v268_v62 = vmax.f32 %v267_v61, 0.0 }
 0x458   :  { %1117 = vmatpush3.bf16.msra.mxu1 %v1095_v10  ;;  %v649_v10 = vld [vmem:[%s1528_s2 + $0x68] sm:$0xff] }
 0x459   :  { %1118 = vmatprep.subr.bf16.mxu1 %v1249_v0  ;;  %v1149_v11 = vpack.c.bf16 %v649_v10, %v648_v9 }
 0x45c   :  { %1120 = vmatpush3.bf16.msra.mxu1 %v1098_v13  ;;  %v651_v13 = vld [vmem:[%s1528_s2 + $0x78] sm:$0xff] }
 0x45d   :  { %1121 = vmatprep.subr.bf16.mxu1 %v1249_v0  ;;  %v1152_v14 = vpack.c.bf16 %v651_v13, %v650_v12 }
 0x460   :  { %1123 = vmatpush3.bf16.msra.mxu1 %v1101_v16 }
 0x461   :  { %1124 = vmatprep.subr.bf16.mxu1 %v1249_v0 }
 0x464   :  { %1126 = vmatpush3.bf16.msra.mxu1 %v1104_v19 }
 0x465   :  { %1127 = vmatprep.subr.bf16.mxu1 %v1249_v0 }
 0x468   :  { %1129 = vmatpush3.bf16.msra.mxu1 %v1107_v22  ;;  %v851_v22 = vld [vmem:[%s1529_s3 + $0xb] ss:$0 sm:$0xff] }
 0x469   :  { %1130 = vmatprep.subr.bf16.mxu1 %v1249_v0 }
 0x46c   :  { %1132 = vmatpush3.bf16.msra.mxu1 %v1110_v35 }
 0x46d   :  { %1154 = vmatprep.subr.bf16.mxu1 %v1249_v0 }
 0x526   :  { %v454_v37 = vpop.f32.mrb[4].mxu1 }
 0x527   :  { %v455_v38 = vadd.f32 %v846_v36, %v454_v37  ;;  %v966_v39 = vpop.f32.mrb[5].mxu1 }
 0x529   :  { %996 = vmatmul.mubr.msk.f32.vlgmr.msra.gmra.mrb[2].mxu0 %vm472_vm3, %v455_v38 }
 0x52a   :  { %1057 = vmatprep.mubr.msk.f32.mxu0 %vm1250_vm0, %v1251_v1  ;;  %1135 = vmatpush3.bf16.msra.mxu0 %v1134_v43 }
 0x52b   :  { %1136 = vmatprep.subr.bf16.mxu0 %v1249_v0 }
 0x52e   :  { %1138 = vmatpush3.bf16.msra.mxu0 %v1137_v45 }
 0x52f   :  { %1139 = vmatprep.subr.bf16.mxu0 %v1249_v0 }
 0x532   :  { %1141 = vmatpush3.bf16.msra.mxu0 %v1140_v3 }
 0x533   :  { %1142 = vmatprep.subr.bf16.mxu0 %v1249_v0 }
 0x5fc   :  { %v542_v55 = vpop.f32.mrb[2].mxu0 }
 0x5fd   :  { %v546_v58 = vsub.f32 %v455_v38, %v542_v55  ;;  %v997_v56 = vpop.f32.mrb[3].mxu0 }
 0x5ff   :  { %v547_v60 = vmul.f32 %v546_v58, %v546_v58 }
 0x601   :  { %1027 = vmatmul.mubr.msk.f32.vlgmr.msra.gmra.mrb[6].mxu1 %vm472_vm3, %v547_v60 }
 0x602   :  { %1156 = vmatpush3.bf16.msra.mxu1 %v1155_v59  ;;  %1064 = vmatprep.mubr.msk.f32.mxu1 %vm1250_vm0, %v1251_v1  ;;  %v645_v1 = vld [vmem:[%s1528_s2 + $0x48] sm:$0xff] }
 0x603   :  { %v1143_v5 = vpack.c.bf16 %v645_v1, %v644_v4 }
 0x605   :  { %1065 = vmatmul.mubr.msk.f32.vlgmr.msra.gmra.mrb[8].mxu1 %vm241_vm2, %v268_v62  ;;  %1144 = vmatpush3.bf16.msra.mxu0 %v1143_v5 }
 0x606   :  { %1145 = vmatprep.subr.bf16.mxu0 %v1249_v0 }
 0x609   :  { %1147 = vmatpush3.bf16.msra.mxu0 %v1146_v8 }
 0x60a   :  { %1148 = vmatprep.subr.bf16.mxu0 %v1249_v0 }
 0x60d   :  { %1150 = vmatpush3.bf16.msra.mxu0 %v1149_v11 }
 0x60e   :  { %1151 = vmatprep.subr.bf16.mxu0 %v1249_v0  ;;  %v850_v0 = vld [vmem:[%s1529_s3 + $0xa] ss:$0 sm:$0xff] }
 0x611   :  { %1153 = vmatpush3.bf16.msra.mxu0 %v1152_v14 }
 0x6d4   :  { %v617_v15 = vpop.f32.mrb[6].mxu1 }
 0x6d5   :  { %v618_v16 = vadd.f32 1e-05, %v617_v15  ;;  %v1028_v17 = vpop.f32.mrb[7].mxu1 }
 0x6d7   :  { %1171 = vrsqrt.f32 %v618_v16 }
 0x6d8   :  { %v794_v18 = vpop.f32.mrb[8].mxu1 }
 0x6d9   :  { %v1066_v19 = vpop.f32.mrb[9].mxu1 }
 0x6e1   :  { %v1172_v20 = vpop.eup %1171 }
 0x6e2   :  { %v622_v21 = vmul.f32 %v1172_v20, %v546_v58 }
 0x6e4   :  { %v628_v23 = vmul.f32 %v850_v0, %v622_v21 }
 0x6e6   :  { %v634_v24 = vadd.f32 %v851_v22, %v628_v23 }
 0x6e8   :  { %v635_v25 = vmax.f32 %v634_v24, 0.0 }
 0x6ea   :  { %1058 = vmatmul.mubr.msk.f32.vlgmr.msra.gmra.mrb[4].mxu0 %vm472_vm3, %v635_v25 }
 0x7bd   :  { %v721_v26 = vpop.f32.mrb[4].mxu0 }
 0x7be   :  { %v795_v28 = vadd.f32 %v794_v18, %v721_v26  ;;  %v1059_v29 = vpop.f32.mrb[5].mxu0 }
 0x7c0   :  { %v803_v30 = vadd.f32 %v854_v27, %v795_v28 }
 0x7c2   :  { %805 = vst.msk [vmem:[#allocation7] sm:$0xff] %vm804_vm4, %v803_v30 }
 0x7c3   :  { %1228 = shalt.err (!%p1225_p6)
}
 0x7c4   :  { %s1229_s28 = scalar_lea.hbm %s1531_s5, 128 }
 0x7c5   :  { %p1230_p7 = scmp.ne.s32.totalorder %s1531_s5, %s1229_s28  ;;  %p1233_p8 = scmp.lt.u32.totalorder %s1229_s28, %s1531_s5 }
 0x7c7   :  { %p1235_p9 = pnand %p1233_p8, %p1230_p7 }
 0x7c9   :  { %1238 = shalt.err (!%p1235_p9)
}
 0x7ca   :  { %815 = dma.vmem_to_hbm [thread:$0]  %s813_s24, 128, %s1531_s5, [#allocation4]  }
 0x7cb   :  { %1243 = dma.done.wait [#allocation4], 128  }
 0x7cc   :  { %1244 = vsyncadd [#allocation4], 4294967168 }
 0x7cd   :  { %819 = vsyncpa [#allocation3], 1 }
 0x7ce   :  { %820 = vsyncpa [#allocation6], 1 }
 0x7cf   :  { %821 = vsyncpa [#allocation4], 1 }

</bundles_post_ra>
